<compile_context>
chip_gen: v5e
topology: v5e:2x2
jax: 0.10.0
libtpu: 0.0.40
codegen_flags: <defaults>
</compile_context>

<pallas_src>
import numpy as np
import jax
import jax.numpy as jnp
from jax.experimental import pallas as pl
from jax.experimental.pallas import tpu as pltpu


def _nn_pool_kernel(obs2_ref, obs1_ref, a_ref, b_ref, bias_ref, out_ref):
    # obs2_ref / obs1_ref : [TB, 2N]   flattened (track, xy) positions
    # a_ref / b_ref       : [2N, N*out_dim]  folded (diff -> select -> Linear) weights
    # bias_ref            : [1, N*out_dim]
    # out_ref             : [TB, N*out_dim]  lane-dense output slab
    acc = jnp.dot(obs2_ref[...], a_ref[...], preferred_element_type=jnp.float32)
    acc = acc + jnp.dot(obs1_ref[...], b_ref[...], preferred_element_type=jnp.float32)
    out_ref[...] = jnp.maximum(acc + bias_ref[...], 0.0)


def _choose_tb(B, cap=1024):
    """Largest multiple-of-8 divisor of B that is <= cap and leaves >= 2 grid steps
    (so both v7x TensorCores get work).  Falls back to TB = B for small/awkward B."""
    best = B
    t = 8
    while t <= min(cap, B // 2):
        if B % t == 0:
            best = t
        t += 8
    return best


def nn_pooling_fast(obs1, obs2, w, bias, *, n=4, out_dim=32, tb=None):
    """obs1, obs2: [B, N, 2] float32.  w: [4, E] (= torch Linear.weight.T), bias: [E]."""
    B, N, _ = obs2.shape
    K = N - 1
    E = out_dim // n
    assert n * E == out_dim
    assert K == n, "NN_Pooling_fast's .view(B, num_tracks, out_dim) requires num_tracks == n + 1"

    w_np = np.asarray(w, np.float32)        # [4, E]
    b_np = np.asarray(bias, np.float32)     # [E]

    # ---- host-side weight preprocessing (data independent, O(KB) numpy) ----------
    # Fold (pairwise difference) o (remove diagonal, increasing-j order) o Linear(4,E)
    # into matrices acting on the flattened inputs.  Exact: every stage is linear.
    F_in = 2 * N                 # flattened (track, xy) per time-step
    F_out = N * K * E            # == N * out_dim
    Mp = np.zeros((F_in, F_out), np.float32)   # acts on positions   (obs2)
    Mv = np.zeros((F_in, F_out), np.float32)   # acts on velocities  (obs2 - obs1)
    for i in range(N):
        for k in range(K):
            j = k if k < i else k + 1          # k-th off-diagonal neighbour (increasing j)
            col = (i * K + k) * E
            for c in range(2):
                Mp[j * 2 + c, col:col + E] += w_np[c]
                Mp[i * 2 + c, col:col + E] -= w_np[c]
                Mv[j * 2 + c, col:col + E] += w_np[2 + c]
                Mv[i * 2 + c, col:col + E] -= w_np[2 + c]
    A = Mp + Mv                  # multiplies obs2_flat (positions + velocity's +obs2 term)
    Bm = -Mv                     # multiplies obs1_flat (velocity's -obs1 term)
    bias_row = np.tile(b_np, N * K).reshape(1, F_out)

    # ---- batch tiling -------------------------------------------------------------
    tb = _choose_tb(B) if tb is None else tb
    assert B % tb == 0, "batch tile must divide B"
    steps = B // tb

    # layout plumbing only: present inputs/outputs as lane-friendly 2-D slabs
    obs1_f = obs1.reshape(B, F_in)
    obs2_f = obs2.reshape(B, F_in)

    out_flat = pl.pallas_call(
        _nn_pool_kernel,
        out_shape=jax.ShapeDtypeStruct((B, F_out), jnp.float32),
        grid=(steps,),
        in_specs=[
            pl.BlockSpec((tb, F_in), lambda s: (s, 0)),        # obs2 (flattened)
            pl.BlockSpec((tb, F_in), lambda s: (s, 0)),        # obs1 (flattened)
            pl.BlockSpec((F_in, F_out), lambda s: (0, 0)),     # A   (VMEM resident)
            pl.BlockSpec((F_in, F_out), lambda s: (0, 0)),     # Bm  (VMEM resident)
            pl.BlockSpec((1, F_out), lambda s: (0, 0)),        # bias row
        ],
        out_specs=pl.BlockSpec((tb, F_out), lambda s: (s, 0)),
        compiler_params=pltpu.CompilerParams(dimension_semantics=("parallel",)),
    )(obs2_f, obs1_f, jnp.asarray(A), jnp.asarray(Bm), jnp.asarray(bias_row))

    return out_flat.reshape(B, N, out_dim)


def ref_forward(obs1, obs2, w, bias, *, n=4, out_dim=32):
    """Pure-JAX reference matching the torch module (w is [4, E] = Linear.weight.T)."""
    B, N, _ = obs2.shape
    K = N - 1
    vel = obs2 - obs1
    rel_p = obs2[:, None, :, :] - obs2[:, :, None, :]   # [B, N, N, 2]; [b,i,j] = obs2[j]-obs2[i]
    rel_v = vel[:, None, :, :] - vel[:, :, None, :]
    nbr = np.array([[k if k < i else k + 1 for k in range(K)] for i in range(N)])  # [N, K]
    ii = np.arange(N)[:, None]
    rel_p = rel_p[:, ii, nbr, :]                         # [B, N, K, 2]
    rel_v = rel_v[:, ii, nbr, :]
    attr = jnp.concatenate([rel_p, rel_v], axis=-1)      # [B, N, K, 4]
    emb = jnp.maximum(attr @ w + bias, 0.0)              # [B, N, K, E]
    return emb.reshape(B, N, out_dim)


if __name__ == "__main__":
    n_neighbors = 4
    out_dim = 32
    N = n_neighbors + 1           # torch .view(B, N, out_dim) implies num_tracks == n + 1
    E = out_dim // n_neighbors    # = 8
    B = 16                        # small demo batch; gives TB=8 -> 2 parallel grid steps

    key = jax.random.PRNGKey(0)
    k1, k2, k3, k4 = jax.random.split(key, 4)
    obs1 = jax.random.normal(k1, (B, N, 2), dtype=jnp.float32)
    obs2 = obs1 + 0.1 * jax.random.normal(k2, (B, N, 2), dtype=jnp.float32)

    # Deterministic Linear(4, E) params (torch-style uniform(-1/sqrt(4), 1/sqrt(4))).
    bound = 1.0 / np.sqrt(4.0)
    w = jax.random.uniform(k3, (4, E), minval=-bound, maxval=bound, dtype=jnp.float32)
    bias = jax.random.uniform(k4, (E,), minval=-bound, maxval=bound, dtype=jnp.float32)

    out = nn_pooling_fast(obs1, obs2, w, bias, n=n_neighbors, out_dim=out_dim)
    out = jax.block_until_ready(out)

    ref = ref_forward(obs1, obs2, w, bias, n=n_neighbors, out_dim=out_dim)
    np.testing.assert_allclose(np.asarray(out), np.asarray(ref), rtol=1e-5, atol=1e-5)

    print("KERNEL_OK")
</pallas_src>

<mosaic_0001>
module attributes {stable_mosaic.version = 11 : i64} {
  func.func @_nn_pool_kernel(%arg0: i32, %arg1: memref<8x10xf32, #tpu.memory_space<vmem>>, %arg2: memref<8x10xf32, #tpu.memory_space<vmem>>, %arg3: memref<10x160xf32, #tpu.memory_space<vmem>>, %arg4: memref<10x160xf32, #tpu.memory_space<vmem>>, %arg5: memref<1x160xf32, #tpu.memory_space<vmem>>, %arg6: memref<8x160xf32, #tpu.memory_space<vmem>>) attributes {dimension_semantics = [#tpu.dimension_semantics<parallel>], iteration_bounds = array<i64: 2>, scalar_prefetch = 0 : i64, scratch_operands = 0 : i64, tpu.core_type = #tpu.core_type<tc>, window_params = [{transform_indices = @transform_0, window_bounds = array<i64: 8, 10>}, {transform_indices = @transform_1, window_bounds = array<i64: 8, 10>}, {pipeline_mode = #tpu.pipeline_mode<synchronous>, transform_indices = @transform_2, window_bounds = array<i64: 10, 160>}, {pipeline_mode = #tpu.pipeline_mode<synchronous>, transform_indices = @transform_3, window_bounds = array<i64: 10, 160>}, {pipeline_mode = #tpu.pipeline_mode<synchronous>, transform_indices = @transform_4, window_bounds = array<i64: 1, 160>}, {transform_indices = @transform_5, window_bounds = array<i64: 8, 160>}]} {
    %c0 = arith.constant 0 : index
    %c0_0 = arith.constant 0 : index
    %0 = vector.load %arg1[%c0, %c0_0] : memref<8x10xf32, #tpu.memory_space<vmem>>, vector<8x10xf32>
    %c0_1 = arith.constant 0 : index
    %c0_2 = arith.constant 0 : index
    %1 = vector.load %arg3[%c0_1, %c0_2] : memref<10x160xf32, #tpu.memory_space<vmem>>, vector<10x160xf32>
    %cst = arith.constant dense<0.000000e+00> : vector<8x160xf32>
    %2 = tpu.matmul %0, %1, %cst {dimension_numbers = #tpu.dot_dimension_numbers<[1], [0], [0], [1], [0, 0, 1, 1], [], []>} : vector<8x10xf32>, vector<10x160xf32>, vector<8x160xf32> -> vector<8x160xf32>
    %c0_3 = arith.constant 0 : index
    %c0_4 = arith.constant 0 : index
    %3 = vector.load %arg2[%c0_3, %c0_4] : memref<8x10xf32, #tpu.memory_space<vmem>>, vector<8x10xf32>
    %c0_5 = arith.constant 0 : index
    %c0_6 = arith.constant 0 : index
    %4 = vector.load %arg4[%c0_5, %c0_6] : memref<10x160xf32, #tpu.memory_space<vmem>>, vector<10x160xf32>
    %cst_7 = arith.constant dense<0.000000e+00> : vector<8x160xf32>
    %5 = tpu.matmul %3, %4, %cst_7 {dimension_numbers = #tpu.dot_dimension_numbers<[1], [0], [0], [1], [0, 0, 1, 1], [], []>} : vector<8x10xf32>, vector<10x160xf32>, vector<8x160xf32> -> vector<8x160xf32>
    %6 = arith.addf %2, %5 : vector<8x160xf32>
    %c0_8 = arith.constant 0 : index
    %c0_9 = arith.constant 0 : index
    %7 = vector.load %arg5[%c0_8, %c0_9] : memref<1x160xf32, #tpu.memory_space<vmem>>, vector<1x160xf32>
    %8 = vector.broadcast %7 : vector<1x160xf32> to vector<8x160xf32>
    %9 = arith.addf %6, %8 : vector<8x160xf32>
    %cst_10 = arith.constant 0.000000e+00 : f32
    %10 = vector.broadcast %cst_10 : f32 to vector<8x160xf32>
    %11 = arith.maximumf %9, %10 : vector<8x160xf32>
    %c0_11 = arith.constant 0 : index
    %c0_12 = arith.constant 0 : index
    %12 = vector.load %arg6[%c0_11, %c0_12] : memref<8x160xf32, #tpu.memory_space<vmem>>, vector<8x160xf32>
    tpu.vector_store %arg6[%c0_11, %c0_12], %11 {strides = array<i32>} : memref<8x160xf32, #tpu.memory_space<vmem>>, vector<8x160xf32>,
    return
  }
  func.func @transform_0(%arg0: i32) -> (i32, i32) {
    %c0_i32 = arith.constant 0 : i32
    %c0_i32_0 = arith.constant 0 : i32
    return %arg0, %c0_i32 : i32, i32
  }
  func.func @transform_1(%arg0: i32) -> (i32, i32) {
    %c0_i32 = arith.constant 0 : i32
    %c0_i32_0 = arith.constant 0 : i32
    return %arg0, %c0_i32 : i32, i32
  }
  func.func @transform_2(%arg0: i32) -> (i32, i32) {
    %c0_i32 = arith.constant 0 : i32
    %c0_i32_0 = arith.constant 0 : i32
    %c0_i32_1 = arith.constant 0 : i32
    return %c0_i32, %c0_i32_0 : i32, i32
  }
  func.func @transform_3(%arg0: i32) -> (i32, i32) {
    %c0_i32 = arith.constant 0 : i32
    %c0_i32_0 = arith.constant 0 : i32
    %c0_i32_1 = arith.constant 0 : i32
    return %c0_i32, %c0_i32_0 : i32, i32
  }
  func.func @transform_4(%arg0: i32) -> (i32, i32) {
    %c0_i32 = arith.constant 0 : i32
    %c0_i32_0 = arith.constant 0 : i32
    %c0_i32_1 = arith.constant 0 : i32
    return %c0_i32, %c0_i32_0 : i32, i32
  }
  func.func @transform_5(%arg0: i32) -> (i32, i32) {
    %c0_i32 = arith.constant 0 : i32
    %c0_i32_0 = arith.constant 0 : i32
    return %arg0, %c0_i32 : i32, i32
  }
}

</mosaic_0001>

<bundles_post_ra>
// kernel: tpu_custom_call.1
= control target key start
LH: loop header
LB: loop body
LE: loop exit
PB: predicated region body
PF: predicated region fallthrough
CT: control target
= control target key end

     0   :  { %s1087_s0 = inlined_call_operand.hbm [shape: f32[16,10], index: 0, kind: input, shape index: {}]   ;;  %s1088_s1 = inlined_call_operand.hbm [shape: f32[16,10], index: 1, kind: input, shape index: {}]   ;;  %s1089_s2 = inlined_call_operand.hbm [shape: f32[10,160], index: 2, kind: input, shape index: {}]   ;;  %s1090_s3 = inlined_call_operand.hbm [shape: f32[10,160], index: 3, kind: input, shape index: {}]   ;;  %s1091_s4 = inlined_call_operand.vmem [shape: f32[1,160], index: 4, kind: input, shape index: {}]   ;;  %s1092_s5 = inlined_call_operand.hbm [shape: f32[16,160], index: 5, kind: output, shape index: {}]  }
   0x1   :  { %1094 = sst [smem:[#allocation18_spill]] %s1089_s2 }
   0x2   :  { %1095 = sst [smem:[#allocation19_spill]] %s1090_s3 }
   0x3   :  { %10 = vsyncpa [#allocation3], 0 }
   0x4   :  { %12 = vsyncpa [#allocation3 + $0x1], 0 }
   0x5   :  { %13 = vsyncpa [#allocation6], 0 }
   0x6   :  { %15 = vsyncpa [#allocation6 + $0x1], 0 }
   0x7   :  { %16 = vsyncpa [#allocation9], 0 }
   0x8   :  { %17 = vsyncpa [#allocation4], 0 }
   0x9   :  { %19 = vsyncpa [#allocation4 + $0x1], 0  ;;  %s903_s18 = smov 0   ;;  %s905_s19 = smov 0  }
   0xa   :  { %s907_s20 = smov 0   ;;  %s909_s21 = smov 0  }
   0xb LB: > { %1096 = sst [smem:[#allocation16_spill]] %s863_s20  ;;  %s927_s25 = sadd.s32 4294967295, %s867_s21   ;;  %s867_s21 = sphi %s909_s21, %s1111_s21   ;;  %s863_s20 = sphi %s907_s20, %s1108_s20   ;;  %s859_s19 = sphi %s905_s19, %s1110_s19   ;;  %s855_s18 = sphi %s903_s18, %s1109_s18  }
   0xc   : > { %s1097_s2 = sld [smem:[#allocation18_spill]]  ;;  %p567_p0 = scmp.ge.s32.totalorder %s867_s21, 1 }
   0xd   : > { %p46_p1 = scmp.eq.s32.totalorder %s927_s25, 0  ;;  %p171_p2 = scmp.lt.s32.totalorder %s867_s21, 3 }
   0xe   : > { %s869_s27 = smov [#allocation7]   ;;  %s1099_s3 = sld [smem:[#allocation19_spill]] }
   0xf   : > { %p932_p3 = pnand %p567_p0, %p171_p2  ;;  %s184_s28 = sshll.u32 %s869_s27, 4  ;;  %s185_s28 = int_to_ptr.vmem [resolvable:$true] %s184_s28 }
  0x10   : > { %s870_s7 = smov [#allocation8]   ;;  %s871_s9 = smov 256  }
  0x11   : > { %p609_p4 = pneg %p932_p3  ;;  %s198_s8 = sshll.u32 %s870_s7, 4  ;;  %s199_s8 = int_to_ptr.vmem [resolvable:$true] %s198_s8 }
  0x12   : > { %s182_s24 = sshll.u32 %s1097_s2, 4  ;;  %s872_s10 = smov 16   ;;  %s183_s24 = int_to_ptr.hbm [resolvable:$true] %s182_s24 }
  0x13   : > { %p610_p6 = pnand %p609_p4, %p46_p1  ;;  %s566_s11 = sadd.s32 4294967294, %s867_s21  }
  0x14   : > { %s196_s6 = sshll.u32 %s1099_s3, 4  ;;  %s946_s12 = sadd.s32 1, %s867_s21   ;;  %s197_s6 = int_to_ptr.hbm [resolvable:$true] %s196_s6 }
  0x15   : > { %612 = dma.hbm_to_vmem [thread:$0]  (!%p610_p6), %s183_s24, 512, %s185_s28, [#allocation6], %s871_s9, %s871_s9, %s872_s10  }
  0x16   : > { %615 = dma.hbm_to_vmem [thread:$0]  (!%p610_p6), %s197_s6, 512, %s199_s8, [#allocation9], %s871_s9, %s871_s9, %s872_s10  }
  0x17   : > { %s29_s13 = ssub.s32 %s867_s21, %s946_s12  ;;  %s32_s14 = sadd.s32 1, %s863_s20 }
  0x18   : > { %p30_p7 = scmp.eq.s32.totalorder %s29_s13, 0  ;;  %p39_p8 = scmp.ne.s32.totalorder %s863_s20, %s859_s19 }
  0x19   : > { %p40_p9 = scmp.eq.s32.totalorder %s867_s21, 0  ;;  %p45_p10 = scmp.ne.s32.totalorder %s859_s19, %s855_s18 }
  0x1a   : > { %s957_s15 = scalar_select %p30_p7, %s863_s20, %s32_s14  }
  0x1b   : > { %p959_p11 = por %p40_p9, %p39_p8  ;;  %p965_p12 = por %p46_p1, %p45_p10 }
  0x1c   : > { %1100 = sst [smem:[#allocation17_spill]] %s957_s15  ;;  %p158_p13 = scmp.eq.s32.totalorder %s927_s25, 1 }
  0x1d   : > { %p164_p0 = scmp.eq.s32.totalorder %s566_s11, 1  ;;  %p629_p2 = scmp.lt.s32.totalorder %s867_s21, 2 }
  0x1e   : > { %s215_s22 = sand.u32 1, %s863_s20   ;;  %p972_p4 = por %p158_p13, %p39_p8 }
  0x1f   : > { %p976_p6 = por %p164_p0, %p45_p10  ;;  %s980_s27 = sshll.u32 %s215_s22, 3 }
  0x20   : > { %s572_s28 = sshll.u32 %s867_s21, 3  ;;  %s219_s7 = scalar_lea.vmem [#allocation2], %s980_s27 }
  0x21   : > { %s223_s6 = scalar_lea.hbm %s1087_s0, %s572_s28  ;;  %s227_s8 = sshll.u32 %s219_s7, 4  ;;  %s228_s8 = int_to_ptr.vmem [resolvable:$true] %s227_s8 }
  0x22   : > { %s225_s9 = sshll.u32 %s223_s6, 4  ;;  %p989_p7 = pnand %p629_p2, %p959_p11  ;;  %s226_s9 = int_to_ptr.hbm [resolvable:$true] %s225_s9 }
  0x23   : > { %s242_s14 = scalar_lea.hbm %s1088_s1, %s572_s28  ;;  %s234_s2 = sand.u32 1, %s867_s21  }
  0x24   : > { %s216_s3 = scalar_lea.sflag [#allocation3], %s215_s22  ;;  %s729_s29 = sshra.s32 %s226_s9, 4  ;;  %s730_s29 = int_to_ptr.hbm [resolvable:$true] %s729_s29 }
  0x25   : > { %s731_s30 = scalar_lea.hbm %s730_s29, 8  ;;  %p733_p9 = pneg %p989_p7 }
  0x26   : > { %p732_p8 = scmp.ne.s32.totalorder %s730_s29, %s731_s30  ;;  %s736_s7 = scalar_lea.hbm %s1087_s0, 16 }
  0x27   : > { %p737_p13 = scmp.lt.s32.totalorder %s730_s29, %s1087_s0  ;;  %p738_p0 = scmp.lt.s32.totalorder %s736_s7, %s731_s30 }
  0x28   : > { %p734_p10 = pnand %p733_p9, %p732_p8 }
  0x29   : > { %p739_p2 = por %p738_p0, %p737_p13 }
  0x2a   : > { %p735_p11 = pneg %p734_p10 }
  0x2c   : > { %p740_p5 = pnand %p739_p2, %p735_p11 }
  0x2e   : > { %743 = shalt.err (!%p740_p5)
}
  0x2f   : > { %619 = dma.hbm_to_vmem [thread:$0]  (!%p989_p7), %s226_s9, 128, %s228_s8, %s216_s3  }
  0x30   : > { %s244_s22 = sshll.u32 %s242_s14, 4  ;;  %s238_s28 = scalar_lea.vmem [#allocation5], %s980_s27  ;;  %s245_s22 = int_to_ptr.hbm [resolvable:$true] %s244_s22 }
  0x31   : > { %s246_s15 = sshll.u32 %s238_s28, 4  ;;  %s235_s16 = scalar_lea.sflag [#allocation6], %s234_s2  ;;  %s247_s15 = int_to_ptr.vmem [resolvable:$true] %s246_s15 }
  0x32   : > { %s759_s6 = sshra.s32 %s245_s22, 4  ;;  %s766_s7 = scalar_lea.hbm %s1088_s1, 16  ;;  %s760_s6 = int_to_ptr.hbm [resolvable:$true] %s759_s6 }
  0x33   : > { %s761_s20 = scalar_lea.hbm %s760_s6, 8  ;;  %p767_p5 = scmp.lt.s32.totalorder %s760_s6, %s1088_s1 }
  0x34   : > { %p762_p8 = scmp.ne.s32.totalorder %s760_s6, %s761_s20  ;;  %p768_p13 = scmp.lt.s32.totalorder %s766_s7, %s761_s20 }
  0x36   : > { %p764_p10 = pnand %p762_p8, %p733_p9  ;;  %p769_p0 = por %p768_p13, %p767_p5 }
  0x38   : > { %p765_p11 = pneg %p764_p10 }
  0x3a   : > { %p770_p2 = pnand %p769_p0, %p765_p11 }
  0x3c   : > { %773 = shalt.err (!%p770_p2)
}
  0x3d   : > { %622 = dma.hbm_to_vmem [thread:$0]  (!%p989_p7), %s245_s22, 128, %s247_s15, %s235_s16  }
  0x3e   : > { %255 = sbr.rel (%p932_p3) target bundleno = 221 (0xdd), region = 40  ;;  %s1025_s2 = sand.u32 (!%p932_p3), 1, %s859_s19  }
  0x3f   : > { %s576_s27 = sshll.u32 (!%p932_p3), %s1025_s2, 3  ;;  %s258_s8 = scalar_lea.sflag (!%p932_p3), [#allocation3], %s1025_s2 }
  0x40   : > { %s261_s9 = scalar_lea.vmem (!%p932_p3), [#allocation2], %s576_s27 }
  0x43   : > { %834 = dma.done.wait (%p965_p12), %s258_s8, 128  }
  0x44   : > { %836 = vsyncadd (%p965_p12), %s258_s8, 4294967168  ;;  %s267_s20 = sand.u32 1, %s927_s25   ;;  %s271_s26 = scalar_lea.vmem [#allocation5], %s576_s27 }
  0x45   : > { %s268_s15 = scalar_lea.sflag [#allocation6], %s267_s20 }
  0x46   : > { %838 = dma.done.wait (%p965_p12), %s268_s15, 128  }
  0x47   : > { %840 = vsyncadd (%p965_p12), %s268_s15, 4294967168 }
  0x48   : > { %842 = dma.done.wait (%p46_p1), [#allocation6], 512  }
  0x49   : > { %844 = vsyncadd (%p46_p1), [#allocation6], 4294966784 }
  0x4a   : > { %846 = dma.done.wait (%p46_p1), [#allocation9], 512  }
  0x4b   : > { %848 = vsyncadd (%p46_p1), [#allocation9], 4294966784  ;;  %vm328_vm0 = vcmask 1041408   ;;  %v317_v0 = vld [vmem:[#allocation7 + $0x10] sm:$0x3]  ;;  %v315_v2 = vld [vmem:[#allocation7] sm:$0xff] }
  0x4c   : > { %v318_v1 = vld [vmem:[#allocation7 + $0x18] sm:$0x3]  ;;  %585 = vmatpush.msk.msra.mxu2 %vm328_vm0, %v317_v0  ;;  %v316_v3 = vld [vmem:[#allocation7 + $0x8] sm:$0xff]  ;;  %vm324_vm1 = vcmask 80896   ;;  %v322_v5 = vld [vmem:[#allocation8 + $0x10] sm:$0x3] }
  0x4d   : > { %587 = vmatpush.msk.msra.mxu3 %vm328_vm0, %v318_v1  ;;  %v314_v4 = vld [vmem:[%s261_s9] sm:$0xff]  ;;  %581 = vmatpush.msk.msra.mxu0 %vm328_vm0, %v322_v5  ;;  %v323_v6 = vld [vmem:[#allocation8 + $0x18] sm:$0x3]  ;;  %s580_s14 = sshll.u32 %s1025_s2, 4  ;;  %s594_s13 = sshll.u32 %s927_s25, 4  ;;  %vm435_vm2 = vcmask 261120  }
  0x4e   : > { %v320_v7 = vld [vmem:[#allocation8] sm:$0xff]  ;;  %399 = vmatpush.msra.mxu2 %v315_v2  ;;  %v319_v8 = vld [vmem:[%s271_s26] sm:$0xff]  ;;  %v321_v9 = vld [vmem:[#allocation8 + $0x8] sm:$0xff]  ;;  %583 = vmatpush.msk.msra.mxu1 %vm328_vm0, %v323_v6  ;;  %s449_s16 = scalar_lea.hbm %s1092_s5, %s594_s13  ;;  %s313_s6 = scalar_lea.vmem [#allocation10], %s580_s14 }
  0x4f   : > { %419 = vmatpush.msra.mxu3 %v316_v3  ;;  %586 = vmatmul.msk.f32.vlgmr.msra.gmra.mxu2 %vm324_vm1, %v314_v4  ;;  %v424_v10 = vld [vmem:[%s1091_s4] sm:$0x3]  ;;  %s451_s29 = sshll.u32 %s313_s6, 4  ;;  %s453_s30 = sshll.u32 %s449_s16, 4  ;;  %s452_s29 = int_to_ptr.vmem [resolvable:$true] %s451_s29  ;;  %s454_s30 = int_to_ptr.hbm [resolvable:$true] %s453_s30 }
  0x50   : > { %588 = vmatmul.msk.f32.vlgmr.msra.gmra.mxu3 %vm324_vm1, %v314_v4  ;;  %350 = vmatpush.msra.mxu0 %v320_v7  ;;  %v426_v13 = vperm.slane %v424_v10, 0  ;;  %v427_v14 = vperm.slane %v424_v10, 1  ;;  %s438_s25 = scalar_lea.sflag [#allocation4], %s1025_s2  ;;  %s803_s7 = sshra.s32 %s454_s30, 4  ;;  %s804_s7 = int_to_ptr.hbm [resolvable:$true] %s803_s7 }
  0x51   : > { %582 = vmatmul.msk.f32.vlgmr.msra.gmra.mxu0 %vm324_vm1, %v319_v8  ;;  %370 = vmatpush.msra.mxu1 %v321_v9  ;;  %s805_s11 = scalar_lea.hbm %s804_s7, 16  ;;  %s809_s8 = scalar_lea.hbm %s1092_s5, 32 }
  0x52   : > { %584 = vmatmul.msk.f32.vlgmr.msra.gmra.mxu1 %vm324_vm1, %v319_v8  ;;  %p806_p1 = scmp.ne.s32.totalorder %s804_s7, %s805_s11  ;;  %p810_p7 = scmp.lt.s32.totalorder %s804_s7, %s1092_s5 }
  0x53   : > { %p811_p9 = scmp.lt.s32.totalorder %s809_s8, %s805_s11 }
  0x54   : > { %p807_p3 = pnand %p806_p1, %p972_p4 }
  0x55   : > { %p812_p8 = por %p811_p9, %p810_p7 }
  0x56   : > { %p808_p12 = pneg %p807_p3 }
  0x58   : > { %p813_p10 = pnand %p812_p8, %p808_p12 }
  0xce   : > { %v352_v11 = vpop.f32.mrf.mxu0 }
  0xcf   : > { %v372_v12 = vpop.f32.mrf.mxu1 }
  0xd2   : > { %v401_v15 = vpop.f32.mrf.mxu2 }
  0xd3   : > { %v421_v16 = vpop.f32.mrf.mxu3  ;;  %v402_v17 = vadd.f32 %v401_v15, %v352_v11 }
  0xd4   : > { %v422_v18 = vadd.f32 %v421_v16, %v372_v12 }
  0xd5   : > { %v430_v19 = vadd.f32 %v426_v13, %v402_v17 }
  0xd6   : > { %v431_v20 = vadd.f32 %v427_v14, %v422_v18 }
  0xd7   : > { %v432_v21 = vmax.f32 %v430_v19, 0.0 }
  0xd8   : > { %v433_v22 = vmax.f32 %v431_v20, 0.0 }
  0xd9   : > { %434 = vst [vmem:[%s313_s6] sm:$0xff] %v432_v21 }
  0xda   : > { %436 = vst.msk [vmem:[%s313_s6 + $0x8] sm:$0xff] %vm435_vm2, %v433_v22 }
  0xdb   : > { %816 = shalt.err (!%p813_p10)
}
  0xdc   : > { %607 = dma.vmem_to_hbm [thread:$0]  (%p972_p4), %s452_s29, 256, %s454_s30, %s438_s25  }
  0xdd PF: > { %s465_s2 = sand.u32 1, %s855_s18   ;;  %p1106_p11 = scmp.ge.s32.totalorder %s867_s21, 2 }
  0xde   : > { %s466_s15 = scalar_lea.sflag [#allocation4], %s465_s2 }
  0xdf   : > { %p624_p5 = pnand %p1106_p11, %p976_p6 }
  0xe1   : > { %p625_p13 = pneg %p624_p5 }
  0xe3   : > { %850 = dma.done.wait (%p625_p13), %s466_s15, 256  }
  0xe4   : > { %852 = vsyncadd (%p625_p13), %s466_s15, 4294967040  ;;  %s1107_s26 = sld [smem:[#allocation16_spill]]  ;;  %p22_p0 = scmp.ge.s32.totalorder %s946_s12, 4  }
  0xe5   : > { %s1108_s20 = sld [smem:[#allocation17_spill]]  ;;  %s1109_s18 = smov %s859_s19 }
  0xe6   : > { %s1111_s21 = smov %s946_s12  ;;  %24 = sbr.rel (!%p22_p0) target bundleno = 11 (0xb), region = 106 }
  0xea   : > { %s1110_s19 = smov %s1107_s26 }
  0xeb   :  { %472 = vsyncpa [#allocation3], 1 }
  0xec   :  { %474 = vsyncpa [#allocation3 + $0x1], 1 }
  0xed   :  { %475 = vsyncpa [#allocation6], 1 }
  0xee   :  { %477 = vsyncpa [#allocation6 + $0x1], 1 }
  0xef   :  { %478 = vsyncpa [#allocation9], 1 }
  0xf0   :  { %479 = vsyncpa [#allocation4], 1 }
  0xf1   :  { %481 = vsyncpa [#allocation4 + $0x1], 1 }

</bundles_post_ra>
